<compile_context>
chip_gen: v5e
topology: v5e:2x2
jax: 0.10.0
libtpu: 0.0.40
codegen_flags: <defaults>
</compile_context>

<pallas_src>
import math

import jax
import jax.numpy as jnp
from jax.experimental import pallas as pl
from jax.experimental.pallas import tpu as pltpu

_EPS = 1e-8          # kornia rgb->hsv epsilon on the saturation denominator
_TINY = 1e-30        # "delta is effectively zero" guard for the hue denominator
_LANE_W = 512        # lane-dense last block dim (multiple of 128 -> unmasked vst)
_MAX_ROWS = 256      # sublane rows per block: 3*256*512*4B = 1.5 MiB per buffer


def _round_up(x, m):
    return ((x + m - 1) // m) * m


def _cdiv(a, b):
    return -(-a // b)


def _hue_shift_pixels(r, g, b, factor6):
    """Per-pixel hue shift. Shared by the Pallas kernel and the pure-JAX reference.

    factor6 is the hue shift expressed in sextant units (radians * 3/pi). All math in f32.
    Algebraically identical to rgb->hsv, h' = fmod(h + factor, 2*pi), hsv->rgb, written in
    sextant units with the arithmetic hsv->rgb form (no 5-deep select chain).
    """
    maxc = jnp.maximum(jnp.maximum(r, g), b)
    minc = jnp.minimum(jnp.minimum(r, g), b)
    v = maxc
    deltac = maxc - minc
    vs = (deltac * maxc) / (maxc + _EPS)            # v * s, kornia: s = delta / (max + eps)
    dsafe = jnp.where(deltac < _TINY, jnp.float32(1.0), deltac)
    rc = maxc - r
    gc = maxc - g
    bc = maxc - b
    h1 = bc - gc
    h2 = (rc - bc) + 2.0 * dsafe
    h3 = (gc - rc) + 4.0 * dsafe
    hraw = jnp.where(r == maxc, h1, jnp.where(g == maxc, h2, h3))
    h6 = hraw / dsafe + factor6                      # hue in sextants, shifted
    # floor-mod (cheaper than lax.rem's sign fixup); handles negative shifts too.
    k0 = h6 - 6.0 * jnp.floor(h6 * (1.0 / 6.0))      # in [0, 6]

    def chan(n):
        k = k0 + n
        k = jnp.where(k >= 6.0, k - 6.0, k)
        w = jnp.clip(jnp.minimum(k, 4.0 - k), 0.0, 1.0)
        return v - vs * w

    return chan(5.0), chan(3.0), chan(1.0)           # R, G, B


def _adjust_hue_kernel(f6_ref, x_ref, o_ref):
    # f6_ref: SMEM (B,) f32 hue shift in sextant units (scalar-prefetched)
    # x_ref / o_ref: VMEM (1, 3, TH, LANE_W)
    factor6 = f6_ref[pl.program_id(0)]
    r = x_ref[0, 0].astype(jnp.float32)
    g = x_ref[0, 1].astype(jnp.float32)
    b = x_ref[0, 2].astype(jnp.float32)
    rr, gg, bb = _hue_shift_pixels(r, g, b, factor6)
    o_ref[0, 0] = rr.astype(o_ref.dtype)
    o_ref[0, 1] = gg.astype(o_ref.dtype)
    o_ref[0, 2] = bb.astype(o_ref.dtype)


def adjust_hue(image, hue_factor):
    """image: (B, 3, H, W) float; hue_factor: python float or (B,) array (radians)."""
    B, C, H, W = image.shape
    if C != 3:
        raise ValueError("adjust_hue expects 3-channel RGB input")
    dtype = image.dtype
    itemsize = jnp.dtype(dtype).itemsize

    # Per-batch hue shift in sextant units (SMEM scalar prefetch).
    factor6 = jnp.asarray(hue_factor, dtype=jnp.float32).reshape(-1) * jnp.float32(3.0 / math.pi)
    factor6 = jnp.broadcast_to(factor6, (B,)).astype(jnp.float32)

    # Flatten spatial pixels and re-tile lane-dense: (B, 3, rows, 512).
    N = H * W
    LW = _LANE_W
    rows = _cdiv(N, LW)
    n_flat = rows * LW
    x = image.reshape(B, 3, N)
    if n_flat != N:
        # Only the ragged tail of the last lane row (< 512 elems/plane) needs padding.
        x = jnp.pad(x, ((0, 0), (0, 0), (0, n_flat - N)))
    x = x.reshape(B, 3, rows, LW)  # zero-copy reshape when H*W is a multiple of 512

    # Row tile: multiple of the sublane granularity (8 for f32, 16 for bf16, ...),
    # or exactly `rows` (the "equal to full dim" exception). Ragged last tiles are
    # handled as partial boundary blocks — no padding of the rows axis.
    sub = 8 * max(1, 4 // itemsize)
    if rows <= _MAX_ROWS:
        th = rows
        if B == 1 and rows > 2 * sub:
            # keep >= 2 row tiles so both TensorCores (v7x megacore) get work
            th = _round_up(_cdiv(rows, 2), sub)
    else:
        th = _MAX_ROWS
    grid = (B, _cdiv(rows, th))

    block = (1, 3, th, LW)
    grid_spec = pltpu.PrefetchScalarGridSpec(
        num_scalar_prefetch=1,
        grid=grid,
        in_specs=[pl.BlockSpec(block, lambda bi, ti, f6: (bi, 0, ti, 0))],
        out_specs=pl.BlockSpec(block, lambda bi, ti, f6: (bi, 0, ti, 0)),
    )
    out = pl.pallas_call(
        _adjust_hue_kernel,
        out_shape=jax.ShapeDtypeStruct((B, 3, rows, LW), dtype),
        grid_spec=grid_spec,
        compiler_params=pltpu.CompilerParams(
            dimension_semantics=("parallel", "parallel"),
        ),
        cost_estimate=pl.CostEstimate(
            flops=60 * B * n_flat,
            transcendentals=2 * B * n_flat,          # two divisions (EUP reciprocals)/pixel
            bytes_accessed=2 * B * 3 * n_flat * itemsize,
        ),
    )(factor6, x)

    out = out.reshape(B, 3, n_flat)
    if n_flat != N:
        out = out[:, :, :N]
    return out.reshape(B, 3, H, W)


class AdjustHue:
    """Mirror of the torch.nn.Module interface."""

    def __init__(self, hue_factor):
        self.hue_factor = hue_factor

    def __call__(self, image):
        return adjust_hue(image, self.hue_factor)


# ---------------- pure-JAX reference for correctness checking ----------------
def _adjust_hue_ref(image, hue_factor):
    B = image.shape[0]
    factor6 = jnp.asarray(hue_factor, dtype=jnp.float32).reshape(-1) * jnp.float32(3.0 / math.pi)
    factor6 = jnp.broadcast_to(factor6, (B,)).astype(jnp.float32)[:, None, None]
    img = image.astype(jnp.float32)
    r, g, b = img[:, 0], img[:, 1], img[:, 2]
    rr, gg, bb = _hue_shift_pixels(r, g, b, factor6)
    return jnp.stack([rr, gg, bb], axis=1).astype(image.dtype)


if __name__ == "__main__":
    key = jax.random.PRNGKey(0)
    x = jax.random.uniform(key, (2, 3, 16, 16), dtype=jnp.float32)

    # scalar hue factor (radians)
    y = AdjustHue(0.7)(x)
    jax.block_until_ready(y)
    assert y.shape == x.shape
    y_ref = _adjust_hue_ref(x, 0.7)
    assert jnp.allclose(y, y_ref, atol=1e-5), "mismatch vs reference (scalar factor)"

    # per-batch hue factor tensor (exercises negative-factor wrap path)
    hue_vec = jnp.array([3.141516, -1.2], dtype=jnp.float32)
    y2 = adjust_hue(x, hue_vec)
    jax.block_until_ready(y2)
    y2_ref = _adjust_hue_ref(x, hue_vec)
    assert jnp.allclose(y2, y2_ref, atol=1e-5), "mismatch vs reference (vector factor)"

    # white image is a fixed point of any hue shift (docstring example)
    ones = jnp.ones((1, 3, 3, 3), dtype=jnp.float32)
    y3 = adjust_hue(ones, 3.141516)
    jax.block_until_ready(y3)
    assert jnp.allclose(y3, ones, atol=1e-5), "hue shift changed a white image"

    # B == 1 with multiple row tiles (exercises the partial boundary block path)
    x4 = jax.random.uniform(jax.random.PRNGKey(1), (1, 3, 96, 128), dtype=jnp.float32)
    y4 = adjust_hue(x4, -0.3)
    jax.block_until_ready(y4)
    y4_ref = _adjust_hue_ref(x4, -0.3)
    assert jnp.allclose(y4, y4_ref, atol=1e-5), "mismatch vs reference (partial row tile)"

    print("KERNEL_OK")
</pallas_src>

<mosaic_0001>
module attributes {stable_mosaic.version = 11 : i64} {
  func.func @_adjust_hue_kernel(%arg0: i32, %arg1: i32, %arg2: memref<2xf32, #tpu.memory_space<smem>>, %arg3: memref<1x3x1x512xf32, #tpu.memory_space<vmem>>, %arg4: memref<1x3x1x512xf32, #tpu.memory_space<vmem>>) attributes {dimension_semantics = [#tpu.dimension_semantics<parallel>, #tpu.dimension_semantics<parallel>], iteration_bounds = array<i64: 2, 1>, scalar_prefetch = 1 : i64, scratch_operands = 0 : i64, tpu.core_type = #tpu.core_type<tc>, window_params = [{transform_indices = @transform_0, window_bounds = array<i64: 1, 3, 1, 512>}, {transform_indices = @transform_1, window_bounds = array<i64: 1, 3, 1, 512>}]} {
    %0 = arith.index_cast %arg0 : i32 to index
    %1 = memref.load %arg2[%0] : memref<2xf32, #tpu.memory_space<smem>>
    %c0 = arith.constant 0 : index
    %c0_0 = arith.constant 0 : index
    %c0_1 = arith.constant 0 : index
    %c0_2 = arith.constant 0 : index
    %2 = vector.load %arg3[%c0, %c0_0, %c0_1, %c0_2] : memref<1x3x1x512xf32, #tpu.memory_space<vmem>>, vector<1x1x1x512xf32>
    %3 = vector.shape_cast %2 : vector<1x1x1x512xf32> to vector<1x512xf32>
    %c0_3 = arith.constant 0 : index
    %c1 = arith.constant 1 : index
    %c0_4 = arith.constant 0 : index
    %c0_5 = arith.constant 0 : index
    %4 = vector.load %arg3[%c0_3, %c1, %c0_4, %c0_5] : memref<1x3x1x512xf32, #tpu.memory_space<vmem>>, vector<1x1x1x512xf32>
    %5 = vector.shape_cast %4 : vector<1x1x1x512xf32> to vector<1x512xf32>
    %c0_6 = arith.constant 0 : index
    %c2 = arith.constant 2 : index
    %c0_7 = arith.constant 0 : index
    %c0_8 = arith.constant 0 : index
    %6 = vector.load %arg3[%c0_6, %c2, %c0_7, %c0_8] : memref<1x3x1x512xf32, #tpu.memory_space<vmem>>, vector<1x1x1x512xf32>
    %7 = vector.shape_cast %6 : vector<1x1x1x512xf32> to vector<1x512xf32>
    %8 = arith.maximumf %3, %5 : vector<1x512xf32>
    %9 = arith.maximumf %8, %7 : vector<1x512xf32>
    %10 = arith.minimumf %3, %5 : vector<1x512xf32>
    %11 = arith.minimumf %10, %7 : vector<1x512xf32>
    %12 = arith.subf %9, %11 : vector<1x512xf32>
    %13 = arith.mulf %12, %9 : vector<1x512xf32>
    %cst = arith.constant 9.99999993E-9 : f32
    %14 = vector.broadcast %cst : f32 to vector<1x512xf32>
    %15 = arith.addf %9, %14 : vector<1x512xf32>
    %16 = arith.divf %13, %15 : vector<1x512xf32>
    %cst_9 = arith.constant 1.000000e-30 : f32
    %17 = vector.broadcast %cst_9 : f32 to vector<1x512xf32>
    %18 = arith.cmpf olt, %12, %17 : vector<1x512xf32>
    %cst_10 = arith.constant 1.000000e+00 : f32
    %19 = vector.broadcast %cst_10 : f32 to vector<1x512xf32>
    %20 = arith.select %18, %19, %12 : vector<1x512xi1>, vector<1x512xf32>
    %21 = arith.subf %9, %3 : vector<1x512xf32>
    %22 = arith.subf %9, %5 : vector<1x512xf32>
    %23 = arith.subf %9, %7 : vector<1x512xf32>
    %24 = arith.subf %23, %22 : vector<1x512xf32>
    %25 = arith.subf %21, %23 : vector<1x512xf32>
    %cst_11 = arith.constant 2.000000e+00 : f32
    %26 = vector.broadcast %cst_11 : f32 to vector<1x512xf32>
    %27 = arith.mulf %26, %20 : vector<1x512xf32>
    %28 = arith.addf %25, %27 : vector<1x512xf32>
    %29 = arith.subf %22, %21 : vector<1x512xf32>
    %cst_12 = arith.constant 4.000000e+00 : f32
    %30 = vector.broadcast %cst_12 : f32 to vector<1x512xf32>
    %31 = arith.mulf %30, %20 : vector<1x512xf32>
    %32 = arith.addf %29, %31 : vector<1x512xf32>
    %33 = arith.cmpf oeq, %3, %9 : vector<1x512xf32>
    %34 = arith.cmpf oeq, %5, %9 : vector<1x512xf32>
    %35 = arith.select %34, %28, %32 : vector<1x512xi1>, vector<1x512xf32>
    %36 = arith.select %33, %24, %35 : vector<1x512xi1>, vector<1x512xf32>
    %37 = arith.divf %36, %20 : vector<1x512xf32>
    %38 = vector.broadcast %1 : f32 to vector<1x512xf32>
    %39 = arith.addf %37, %38 : vector<1x512xf32>
    %cst_13 = arith.constant 0.166666672 : f32
    %40 = vector.broadcast %cst_13 : f32 to vector<1x512xf32>
    %41 = arith.mulf %39, %40 : vector<1x512xf32>
    %42 = math.floor %41 : vector<1x512xf32>
    %cst_14 = arith.constant 6.000000e+00 : f32
    %43 = vector.broadcast %cst_14 : f32 to vector<1x512xf32>
    %44 = arith.mulf %43, %42 : vector<1x512xf32>
    %45 = arith.subf %39, %44 : vector<1x512xf32>
    %cst_15 = arith.constant 5.000000e+00 : f32
    %46 = vector.broadcast %cst_15 : f32 to vector<1x512xf32>
    %47 = arith.addf %45, %46 : vector<1x512xf32>
    %cst_16 = arith.constant 6.000000e+00 : f32
    %48 = vector.broadcast %cst_16 : f32 to vector<1x512xf32>
    %49 = arith.cmpf oge, %47, %48 : vector<1x512xf32>
    %cst_17 = arith.constant 6.000000e+00 : f32
    %50 = vector.broadcast %cst_17 : f32 to vector<1x512xf32>
    %51 = arith.subf %47, %50 : vector<1x512xf32>
    %52 = arith.select %49, %51, %47 : vector<1x512xi1>, vector<1x512xf32>
    %cst_18 = arith.constant 4.000000e+00 : f32
    %53 = vector.broadcast %cst_18 : f32 to vector<1x512xf32>
    %54 = arith.subf %53, %52 : vector<1x512xf32>
    %55 = arith.minimumf %52, %54 : vector<1x512xf32>
    %cst_19 = arith.constant 0.000000e+00 : f32
    %cst_20 = arith.constant 1.000000e+00 : f32
    %56 = vector.broadcast %cst_19 : f32 to vector<1x512xf32>
    %57 = arith.maximumf %56, %55 : vector<1x512xf32>
    %58 = vector.broadcast %cst_20 : f32 to vector<1x512xf32>
    %59 = arith.minimumf %58, %57 : vector<1x512xf32>
    %60 = arith.mulf %16, %59 : vector<1x512xf32>
    %61 = arith.subf %9, %60 : vector<1x512xf32>
    %cst_21 = arith.constant 3.000000e+00 : f32
    %62 = vector.broadcast %cst_21 : f32 to vector<1x512xf32>
    %63 = arith.addf %45, %62 : vector<1x512xf32>
    %cst_22 = arith.constant 6.000000e+00 : f32
    %64 = vector.broadcast %cst_22 : f32 to vector<1x512xf32>
    %65 = arith.cmpf oge, %63, %64 : vector<1x512xf32>
    %cst_23 = arith.constant 6.000000e+00 : f32
    %66 = vector.broadcast %cst_23 : f32 to vector<1x512xf32>
    %67 = arith.subf %63, %66 : vector<1x512xf32>
    %68 = arith.select %65, %67, %63 : vector<1x512xi1>, vector<1x512xf32>
    %cst_24 = arith.constant 4.000000e+00 : f32
    %69 = vector.broadcast %cst_24 : f32 to vector<1x512xf32>
    %70 = arith.subf %69, %68 : vector<1x512xf32>
    %71 = arith.minimumf %68, %70 : vector<1x512xf32>
    %cst_25 = arith.constant 0.000000e+00 : f32
    %cst_26 = arith.constant 1.000000e+00 : f32
    %72 = vector.broadcast %cst_25 : f32 to vector<1x512xf32>
    %73 = arith.maximumf %72, %71 : vector<1x512xf32>
    %74 = vector.broadcast %cst_26 : f32 to vector<1x512xf32>
    %75 = arith.minimumf %74, %73 : vector<1x512xf32>
    %76 = arith.mulf %16, %75 : vector<1x512xf32>
    %77 = arith.subf %9, %76 : vector<1x512xf32>
    %cst_27 = arith.constant 1.000000e+00 : f32
    %78 = vector.broadcast %cst_27 : f32 to vector<1x512xf32>
    %79 = arith.addf %45, %78 : vector<1x512xf32>
    %cst_28 = arith.constant 6.000000e+00 : f32
    %80 = vector.broadcast %cst_28 : f32 to vector<1x512xf32>
    %81 = arith.cmpf oge, %79, %80 : vector<1x512xf32>
    %cst_29 = arith.constant 6.000000e+00 : f32
    %82 = vector.broadcast %cst_29 : f32 to vector<1x512xf32>
    %83 = arith.subf %79, %82 : vector<1x512xf32>
    %84 = arith.select %81, %83, %79 : vector<1x512xi1>, vector<1x512xf32>
    %cst_30 = arith.constant 4.000000e+00 : f32
    %85 = vector.broadcast %cst_30 : f32 to vector<1x512xf32>
    %86 = arith.subf %85, %84 : vector<1x512xf32>
    %87 = arith.minimumf %84, %86 : vector<1x512xf32>
    %cst_31 = arith.constant 0.000000e+00 : f32
    %cst_32 = arith.constant 1.000000e+00 : f32
    %88 = vector.broadcast %cst_31 : f32 to vector<1x512xf32>
    %89 = arith.maximumf %88, %87 : vector<1x512xf32>
    %90 = vector.broadcast %cst_32 : f32 to vector<1x512xf32>
    %91 = arith.minimumf %90, %89 : vector<1x512xf32>
    %92 = arith.mulf %16, %91 : vector<1x512xf32>
    %93 = arith.subf %9, %92 : vector<1x512xf32>
    %c0_33 = arith.constant 0 : index
    %c0_34 = arith.constant 0 : index
    %c0_35 = arith.constant 0 : index
    %c0_36 = arith.constant 0 : index
    %94 = vector.load %arg4[%c0_33, %c0_34, %c0_35, %c0_36] : memref<1x3x1x512xf32, #tpu.memory_space<vmem>>, vector<1x1x1x512xf32>
    %95 = vector.shape_cast %94 : vector<1x1x1x512xf32> to vector<1x512xf32>
    %96 = vector.shape_cast %61 : vector<1x512xf32> to vector<1x1x1x512xf32>
    tpu.vector_store %arg4[%c0_33, %c0_34, %c0_35, %c0_36], %96 {strides = array<i32>} : memref<1x3x1x512xf32, #tpu.memory_space<vmem>>, vector<1x1x1x512xf32>,
    %c0_37 = arith.constant 0 : index
    %c1_38 = arith.constant 1 : index
    %c0_39 = arith.constant 0 : index
    %c0_40 = arith.constant 0 : index
    %97 = vector.load %arg4[%c0_37, %c1_38, %c0_39, %c0_40] : memref<1x3x1x512xf32, #tpu.memory_space<vmem>>, vector<1x1x1x512xf32>
    %98 = vector.shape_cast %97 : vector<1x1x1x512xf32> to vector<1x512xf32>
    %99 = vector.shape_cast %77 : vector<1x512xf32> to vector<1x1x1x512xf32>
    tpu.vector_store %arg4[%c0_37, %c1_38, %c0_39, %c0_40], %99 {strides = array<i32>} : memref<1x3x1x512xf32, #tpu.memory_space<vmem>>, vector<1x1x1x512xf32>,
    %c0_41 = arith.constant 0 : index
    %c2_42 = arith.constant 2 : index
    %c0_43 = arith.constant 0 : index
    %c0_44 = arith.constant 0 : index
    %100 = vector.load %arg4[%c0_41, %c2_42, %c0_43, %c0_44] : memref<1x3x1x512xf32, #tpu.memory_space<vmem>>, vector<1x1x1x512xf32>
    %101 = vector.shape_cast %100 : vector<1x1x1x512xf32> to vector<1x512xf32>
    %102 = vector.shape_cast %93 : vector<1x512xf32> to vector<1x1x1x512xf32>
    tpu.vector_store %arg4[%c0_41, %c2_42, %c0_43, %c0_44], %102 {strides = array<i32>} : memref<1x3x1x512xf32, #tpu.memory_space<vmem>>, vector<1x1x1x512xf32>,
    return
  }
  func.func @transform_0(%arg0: i32, %arg1: i32, %arg2: memref<2xf32, #tpu.memory_space<smem>>) -> (i32, i32, i32, i32) {
    %c0_i32 = arith.constant 0 : i32
    %c0_i32_0 = arith.constant 0 : i32
    %c0_i32_1 = arith.constant 0 : i32
    return %arg0, %c0_i32, %arg1, %c0_i32_0 : i32, i32, i32, i32
  }
  func.func @transform_1(%arg0: i32, %arg1: i32, %arg2: memref<2xf32, #tpu.memory_space<smem>>) -> (i32, i32, i32, i32) {
    %c0_i32 = arith.constant 0 : i32
    %c0_i32_0 = arith.constant 0 : i32
    %c0_i32_1 = arith.constant 0 : i32
    return %arg0, %c0_i32, %arg1, %c0_i32_0 : i32, i32, i32, i32
  }
}

</mosaic_0001>

<bundles_post_ra>
// kernel: tpu_custom_call.1
= control target key start
LH: loop header
LB: loop body
LE: loop exit
PB: predicated region body
PF: predicated region fallthrough
CT: control target
= control target key end

     0   :  { %s586_s12 = smov [#allocation3]   ;;  %s758_s0 = inlined_call_operand.hbm [shape: f32[2], index: 0, kind: input, shape index: {}]   ;;  %s759_s1 = inlined_call_operand.hbm [shape: f32[2,3,1,512], index: 1, kind: input, shape index: {}]   ;;  %s760_s2 = inlined_call_operand.hbm [shape: f32[2,3,1,512], index: 2, kind: output, shape index: {}]  }
   0x1   :  { %s8_s11 = sshll.u32 %s758_s0, 4  ;;  %s9_s11 = int_to_ptr.hbm [resolvable:$true] %s8_s11 }
   0x2   :  { %11 = dma.hbm_to_smem %s9_s11, 16, %s586_s12, [#allocation2] }
   0x3   :  { %552 = dma.done.wait [#allocation2], 16 }
   0x4   :  { %553 = vsyncadd [#allocation2], 4294967280 }
   0x5   :  { %14 = sfence }
   0x6   :  { %15 = vsyncpa [#allocation5], 0 }
   0x7   :  { %17 = vsyncpa [#allocation5 + $0x1], 0 }
   0x8   :  { %18 = vsyncpa [#allocation6], 0 }
   0x9   :  { %20 = vsyncpa [#allocation6 + $0x1], 0  ;;  %s609_s13 = smov 0   ;;  %s611_s14 = smov 0  }
   0xa   :  { %s613_s15 = smov 0   ;;  %s615_s16 = smov 0  }
   0xb   :  { %s617_s17 = smov 0   ;;  %s619_s0 = smov 0  }
   0xc LB: > { %s369_s18 = sadd.s32 4294967295, %s584_s0   ;;  %s370_s19 = sadd.s32 4294967294, %s584_s0   ;;  %s584_s0 = sphi %s619_s0, %s26_s0   ;;  %s580_s17 = sphi %s617_s17, %s771_s17   ;;  %s576_s16 = sphi %s615_s16, %s770_s16   ;;  %s572_s15 = sphi %s613_s15, %s769_s15   ;;  %s568_s14 = sphi %s611_s14, %s768_s14   ;;  %s564_s13 = sphi %s609_s13, %s767_s13  }
   0xd   : > { %s38_s20 = sadd.s32 1, %s580_s17  ;;  %s47_s21 = sadd.s32 1, %s572_s15 }
   0xe   : > { %p40_p0 = scmp.ge.s32.totalorder %s38_s20, 2  ;;  %p54_p1 = scmp.ne.s32.totalorder %s572_s15, %s568_s14 }
   0xf   : > { %p55_p2 = scmp.eq.s32.totalorder %s584_s0, 0  ;;  %p60_p3 = scmp.ne.s32.totalorder %s568_s14, %s564_s13 }
  0x10   : > { %s773_s20 = smov (%p40_p0, %s38_s20), 0  ;;  %p61_p5 = scmp.eq.s32.totalorder %s369_s18, 0 }
  0x11   : > { %p650_p4 = por %p55_p2, %p54_p1  ;;  %s42_s23 = ssub.s32 %s580_s17, %s773_s20 }
  0x12   : > { %p86_p6 = scmp.eq.s32.totalorder %s369_s18, 1  ;;  %p45_p7 = scmp.eq.s32.totalorder %s42_s23, 0 }
  0x13   : > { %p656_p8 = por %p61_p5, %p60_p3  ;;  %p92_p10 = scmp.eq.s32.totalorder %s370_s19, 1 }
  0x14   : > { %p660_p9 = por %p86_p6, %p54_p1  ;;  %p372_p12 = scmp.ge.s32.totalorder %s584_s0, 2 }
  0x15   : > { %s665_s26 = scalar_select %p45_p7, %s572_s15, %s47_s21  }
  0x16   : > { %p667_p11 = por %p92_p10, %p60_p3  ;;  %p399_p13 = scmp.lt.s32.totalorder %s584_s0, 2 }
  0x17   : > { %s112_s28 = sand.u32 1, %s572_s15   ;;  %s384_s30 = smul.u32 12, %s580_s17 }
  0x18   : > { %s383_s29 = smul.u32 12, %s112_s28  ;;  %p392_p0 = pnand %p399_p13, %p650_p4 }
  0x19   : > { %s122_s5 = scalar_lea.hbm %s759_s1, %s384_s30  ;;  %p373_p1 = scmp.ge.s32.totalorder %s584_s0, 1 }
  0x1a   : > { %s116_s6 = scalar_lea.vmem [#allocation4], %s383_s29  ;;  %s123_s8 = sshll.u32 %s122_s5, 4  ;;  %s124_s8 = int_to_ptr.hbm [resolvable:$true] %s123_s8 }
  0x1b   : > { %s125_s7 = sshll.u32 %s116_s6, 4  ;;  %s113_s9 = scalar_lea.sflag [#allocation5], %s112_s28  ;;  %s126_s7 = int_to_ptr.vmem [resolvable:$true] %s125_s7 }
  0x1c   : > { %s587_s10 = smov 64   ;;  %s588_s11 = smov 4  }
  0x1d   : > { %394 = dma.hbm_to_vmem [thread:$0]  (!%p392_p0), %s124_s8, 192, %s126_s7, %s113_s9, %s587_s10, %s587_s10, %s588_s11  }
  0x1e   : > { %p133_p2 = scmp.lt.s32.totalorder %s584_s0, 3 }
  0x20   : > { %p134_p3 = pnand %p373_p1, %p133_p2 }
  0x21   : > { %s683_s12 = sand.u32 (!%p134_p3), 1, %s568_s14  }
  0x22   : > { %137 = sbr.rel (%p134_p3) target bundleno = 101 (0x65), region = 24  ;;  %s140_s19 = scalar_lea.sflag (!%p134_p3), [#allocation5], %s683_s12 }
  0x23   : > { %s385_s18 = smul.u32 (!%p134_p3), 12, %s683_s12 }
  0x25   : > { %s143_s21 = scalar_lea.vmem (!%p134_p3), [#allocation4], %s385_s18 }
  0x27   : > { %555 = dma.done.wait (%p656_p8), %s140_s19, 192  }
  0x28   : > { %557 = vsyncadd (%p656_p8), %s140_s19, 4294967104  ;;  %v164_v0 = vld [vmem:[%s143_s21] sm:$0xf]  ;;  %v374_v1 = vld [vmem:[%s143_s21 + $0x4] sm:$0xf]  ;;  %s163_s22 = sld [smem:[#allocation3 + %s576_s16]] }
  0x29   : > { %v375_v2 = vld [vmem:[%s143_s21 + $0x8] sm:$0xf]  ;;  %v169_v3 = vmax.f32 %v164_v0, %v374_v1  ;;  %v171_v4 = vmin.f32 %v164_v0, %v374_v1  ;;  %s386_s23 = smul.u32 12, %s576_s16  ;;  %s162_s30 = scalar_lea.vmem [#allocation7], %s385_s18 }
  0x2a   : > { %s281_s3 = sshll.u32 %s162_s30, 4  ;;  %s268_s4 = scalar_lea.sflag [#allocation6], %s683_s12  ;;  %s282_s3 = int_to_ptr.vmem [resolvable:$true] %s281_s3 }
  0x2b   : > { %v693_v5 = vmax.f32 %v169_v3, %v375_v2  ;;  %v172_v6 = vmin.f32 %v171_v4, %v375_v2  ;;  %s280_s29 = scalar_lea.hbm %s760_s2, %s386_s23  ;;  %s520_s9 = scalar_lea.hbm %s760_s2, 24 }
  0x2c   : > { %s283_s16 = sshll.u32 %s280_s29, 4  ;;  %s284_s16 = int_to_ptr.hbm [resolvable:$true] %s283_s16 }
  0x2d   : > { %v696_v7 = vsub.f32 %v693_v5, %v172_v6  ;;  %v193_v9 = vsub.f32 %v693_v5, %v164_v0  ;;  %v194_v10 = vsub.f32 %v693_v5, %v374_v1  ;;  %v195_v11 = vsub.f32 %v693_v5, %v375_v2  ;;  %s514_s5 = sshra.s32 %s284_s16, 4  ;;  %s515_s5 = int_to_ptr.hbm [resolvable:$true] %s514_s5 }
  0x2e   : > { %v175_v12 = vadd.f32 1e-08, %v693_v5  ;;  %vm204_vm1 = vcmp.eq.f32.partialorder %v374_v1, %v693_v5  ;;  %vm203_vm4 = vcmp.eq.f32.partialorder %v164_v0, %v693_v5  ;;  %v222_v33 = vstv %s163_s22  ;;  %s516_s6 = scalar_lea.hbm %s515_s5, 12  ;;  %p521_p7 = scmp.lt.s32.totalorder %s515_s5, %s760_s2 }
  0x2f   : > { %vm191_vm0 = vcmp.lt.f32.partialorder %v696_v7, 1e-30  ;;  %v197_v13 = vsub.f32 %v193_v9, %v195_v11  ;;  %v200_v15 = vsub.f32 %v194_v10, %v193_v9  ;;  %v196_v24 = vsub.f32 %v195_v11, %v194_v10  ;;  %p517_p4 = scmp.ne.s32.totalorder %s515_s5, %s516_s6  ;;  %p522_p8 = scmp.lt.s32.totalorder %s520_s9, %s516_s6 }
  0x30   : > { %v192_v8 = vsel %vm191_vm0, 1.0, %v696_v7  ;;  %vm181_vm7 = vweird.f32 %v175_v12  ;;  %v187_v42 = vand.u32 2147483648, %v175_v12  ;;  %v185_v45 = vand.u32 2147483647, %v175_v12 }
  0x31   : > { %454 = vrcp.f32 %v192_v8  ;;  %v198_v14 = vmul.f32 2.0, %v192_v8  ;;  %v201_v16 = vmul.f32 4.0, %v192_v8  ;;  %v218_v21 = vand.u32 2147483648, %v192_v8  ;;  %p518_p5 = pnand %p517_p4, %p660_p9  ;;  %p523_p10 = por %p522_p8, %p521_p7 }
  0x32   : > { %456 = vrcp.f32 %v175_v12  ;;  %vm212_vm2 = vweird.f32 %v192_v8  ;;  %v216_v23 = vand.u32 2147483647, %v192_v8  ;;  %v188_v50 = vor.u32 1.1754944e-38, %v187_v42 }
  0x33   : > { %v199_v18 = vadd.f32 %v198_v14, %v197_v13  ;;  %v202_v19 = vadd.f32 %v201_v16, %v200_v15  ;;  %v219_v27 = vor.u32 1.1754944e-38, %v218_v21  ;;  %vm186_vm12 = vcmp.eq.f32.partialorder %v185_v45, 8.507059e+37  ;;  %p519_p6 = pneg %p518_p5 }
  0x34   : > { %vm217_vm6 = vcmp.eq.f32.partialorder %v216_v23, 8.507059e+37  ;;  %v174_v57 = vmul.f32 %v696_v7, %v693_v5  ;;  %v258_v6 = vlaneseq }
  0x35   : > { %v205_v25 = vsel %vm204_vm1, %v199_v18, %v202_v19  ;;  %p524_p13 = pnand %p523_p10, %p519_p6 }
  0x36   : > { %v206_v30 = vsel %vm203_vm4, %v196_v24, %v205_v25  ;;  %vm260_vm14 = vcmp.lt.s32.totalorder %v258_v6, 512 }
  0x37   : > { %v455_v17 = vpop.eup %454 }
  0x38   : > { %v208_v20 = vmul.f32 %v455_v17, %v192_v8  ;;  %vm213_vm3 = vweird.f32 %v455_v17  ;;  %v457_v28 = vpop.eup %456 }
  0x39   : > { %vm214_vm5 = vmor %vm212_vm2, %vm213_vm3  ;;  %v177_v34 = vmul.f32 %v457_v28, %v175_v12  ;;  %vm182_vm8 = vweird.f32 %v457_v28 }
  0x3a   : > { %v209_v22 = vsub.f32 1.0, %v208_v20  ;;  %vm707_vm9 = vmor %vm181_vm7, %vm182_vm8 }
  0x3b   : > { %v178_v37 = vsub.f32 1.0, %v177_v34 }
  0x3c   : > { %v210_v26 = vmul.f32 %v455_v17, %v209_v22 }
  0x3d   : > { %v179_v40 = vmul.f32 %v457_v28, %v178_v37 }
  0x3e   : > { %v211_v29 = vadd.f32 %v455_v17, %v210_v26 }
  0x3f   : > { %v180_v44 = vadd.f32 %v457_v28, %v179_v40 }
  0x40   : > { %v215_v31 = vsel %vm214_vm5, %v455_v17, %v211_v29 }
  0x41   : > { %v220_v32 = vsel %vm217_vm6, %v219_v27, %v215_v31  ;;  %v184_v53 = vsel %vm707_vm9, %v457_v28, %v180_v44 }
  0x42   : > { %v221_v35 = vmul.f32 %v220_v32, %v206_v30  ;;  %v189_v61 = vsel %vm186_vm12, %v188_v50, %v184_v53 }
  0x43   : > { %v190_v2 = vmul.f32 %v189_v61, %v174_v57 }
  0x44   : > { %v223_v36 = vadd.f32 %v222_v33, %v221_v35 }
  0x46   : > { %v224_v38 = vmul.f32 0.16666667, %v223_v36 }
  0x48   : > { %v225_v39 = vfloor.f32 %v224_v38 }
  0x4a   : > { %v226_v41 = vmul.f32 6.0, %v225_v39 }
  0x4c   : > { %v227_v43 = vsub.f32 %v223_v36, %v226_v41 }
  0x4e   : > { %v228_v47 = vadd.f32 5.0, %v227_v43  ;;  %v238_v48 = vadd.f32 3.0, %v227_v43  ;;  %v248_v49 = vadd.f32 1.0, %v227_v43 }
  0x50   : > { %vm229_vm10 = vcmp.ge.f32.partialorder %v228_v47, 6.0  ;;  %v376_v51 = vadd.f32 -6.0, %v228_v47  ;;  %vm239_vm11 = vcmp.ge.f32.partialorder %v238_v48, 6.0  ;;  %v377_v52 = vadd.f32 -6.0, %v238_v48 }
  0x51   : > { %vm249_vm13 = vcmp.ge.f32.partialorder %v248_v49, 6.0  ;;  %v378_v54 = vadd.f32 -6.0, %v248_v49 }
  0x52   : > { %v231_v55 = vsel %vm229_vm10, %v376_v51, %v228_v47  ;;  %v241_v56 = vsel %vm239_vm11, %v377_v52, %v238_v48 }
  0x53   : > { %v232_v58 = vsub.f32 4.0, %v231_v55  ;;  %v242_v59 = vsub.f32 4.0, %v241_v56  ;;  %v251_v60 = vsel %vm249_vm13, %v378_v54, %v248_v49 }
  0x54   : > { %v252_v62 = vsub.f32 4.0, %v251_v60 }
  0x55   : > { %v233_v63 = vmin.f32 %v231_v55, %v232_v58  ;;  %v243_v0 = vmin.f32 %v241_v56, %v242_v59 }
  0x56   : > { %v253_v1 = vmin.f32 %v251_v60, %v252_v62 }
  0x57   : > { %v234_v3 = vmax.f32 %v233_v63, 0.0  ;;  %v244_v4 = vmax.f32 %v243_v0, 0.0 }
  0x58   : > { %v254_v8 = vmax.f32 %v253_v1, 0.0 }
  0x59   : > { %v235_v9 = vmin.f32 %v234_v3, 1.0  ;;  %v245_v10 = vmin.f32 %v244_v4, 1.0 }
  0x5a   : > { %v255_v7 = vmin.f32 %v254_v8, 1.0 }
  0x5b   : > { %v236_v11 = vmul.f32 %v235_v9, %v190_v2  ;;  %v246_v12 = vmul.f32 %v245_v10, %v190_v2 }
  0x5c   : > { %v256_v13 = vmul.f32 %v255_v7, %v190_v2 }
  0x5d   : > { %v237_v14 = vsub.f32 %v693_v5, %v236_v11  ;;  %v247_v15 = vsub.f32 %v693_v5, %v246_v12 }
  0x5e   : > { %v257_v16 = vsub.f32 %v693_v5, %v256_v13 }
  0x5f   : > { %262 = vst.msk [vmem:[%s162_s30] sm:$0xf] %vm260_vm14, %v237_v14 }
  0x60   : > { %379 = vst.msk [vmem:[%s162_s30 + $0x4] sm:$0xf] %vm260_vm14, %v247_v15 }
  0x61   : > { %380 = vst.msk [vmem:[%s162_s30 + $0x8] sm:$0xf] %vm260_vm14, %v257_v16 }
  0x62   : > { %527 = shalt.err (!%p524_p13)
}
  0x63   : > { %s589_s12 = smov 64   ;;  %s590_s18 = smov 4  }
  0x64   : > { %389 = dma.vmem_to_hbm [thread:$0]  (%p660_p9), %s282_s3, 192, %s284_s16, %s268_s4, %s589_s12, %s589_s12, %s590_s18  }
  0x65 PF: > { %s298_s19 = sand.u32 1, %s564_s13   ;;  %p396_p0 = pnand %p372_p12, %p667_p11 }
  0x66   : > { %s299_s21 = scalar_lea.sflag [#allocation6], %s298_s19 }
  0x67   : > { %p397_p1 = pneg %p396_p0 }
  0x69   : > { %559 = dma.done.wait (%p397_p1), %s299_s21, 192  }
  0x6a   : > { %561 = vsyncadd (%p397_p1), %s299_s21, 4294967104  ;;  %s26_s0 = sadd.s32 1, %s584_s0   ;;  %s767_s13 = smov %s568_s14 }
  0x6b   : > { %p23_p2 = scmp.ge.s32.totalorder %s26_s0, 4   ;;  %s768_s14 = smov %s572_s15 }
  0x6c   : > { %s769_s15 = smov %s665_s26  ;;  %s770_s16 = smov %s580_s17 }
  0x6d   : > { %s771_s17 = smov %s773_s20  ;;  %25 = sbr.rel (!%p23_p2) target bundleno = 12 (0xc), region = 73 }
  0x72   :  { %305 = vsyncpa [#allocation5], 1 }
  0x73   :  { %307 = vsyncpa [#allocation5 + $0x1], 1 }
  0x74   :  { %308 = vsyncpa [#allocation6], 1 }
  0x75   :  { %310 = vsyncpa [#allocation6 + $0x1], 1 }

</bundles_post_ra>
